<compile_context>
chip_gen: v6e
topology: v6e:2x2x1
jax: 0.10.0
libtpu: 0.0.40
codegen_flags: <defaults>
</compile_context>

<pallas_src>
import numpy as np
import jax
import jax.numpy as jnp
from jax.experimental import pallas as pl
from jax.experimental.pallas import tpu as pltpu


def _round_up(n, m):
    return ((n + m - 1) // m) * m


def hash_embedding_bag_kernel(mapped_ref, wt_ref, out_ref):
    """One (batch tile, H tile) step of the multi-update hashed bag (mode='sum').

    mapped_ref: (U, L, TB) int32 -- hashed row ids, batch on the lane dim
    wt_ref:     (D, TH)    f32   -- slice of the pre-transposed weight table
    out_ref:    (D, TB)    f32   -- transposed output tile, resident across H axis
    """
    U, L, TB = mapped_ref.shape
    D, TH = wt_ref.shape
    h = pl.program_id(1)

    @pl.when(h == 0)
    def _():
        out_ref[...] = jnp.zeros_like(out_ref)

    # Row ids covered by this H tile; built exactly once (JAX does not CSE
    # iota/broadcast, so keep it out of the item loop).
    hids = jax.lax.broadcasted_iota(jnp.int32, (TH, TB), 0) + h * TH

    # counts[r, b] = #{(u, l) : mapped[u, l, b] == h*TH + r}, accumulated
    # directly in int32.  Per update u, load the whole (L, TB) slab once
    # (unmasked vld per vreg) instead of U*L masked (1, TB) loads.
    counts = jnp.zeros((TH, TB), dtype=jnp.int32)
    for u in range(U):                        # static, small trip counts
        slab = mapped_ref[u]                  # (L, TB)
        for l in range(L):
            ids = jax.lax.slice_in_dim(slab, l, l + 1, axis=0)   # (1, TB)
            counts = counts + (hids == ids).astype(jnp.int32)

    # One MXU matmul per H tile: out^T += W^T[:, tile] @ counts.  Counts are
    # exact small ints; stay f32 to remain bit-comparable with the reference.
    # TODO(synk): run the matmul in bf16 when the model tolerates it and the
    # matmul (not the VALU count build) is the binding unit.
    out_ref[...] += jnp.dot(wt_ref[...], counts.astype(jnp.float32),
                            preferred_element_type=jnp.float32)


def multi_update_hash_embedding_bag(x, hashed_weight, weight_idx, *, tb=256):
    """x: (B, L) int32 bags; hashed_weight: (H, D) f32; weight_idx: (U, N) int32."""
    B, L = x.shape
    H, D = hashed_weight.shape
    U = weight_idx.shape[0]

    # Compose the per-update hash maps with the bag indices directly in
    # (U, L, B) layout: transpose the tiny (B, L) x, not the big gather output.
    mapped = weight_idx[:, jnp.transpose(x)].astype(jnp.int32)       # (U, L, B)

    # Pre-transpose W once so the in-kernel matmul writes a (D, TB) tile whose
    # lane dim is the batch tile -> lane-dense stores while D < 128.
    # TODO(synk): for D >= 128 emit (B, D) directly (counts^T @ W) and drop the
    # wrapper-side output transpose.
    w_t = jnp.transpose(hashed_weight)                               # (D, H)

    # ---- generation-aware VMEM ceiling --------------------------------------
    try:
        vmem_cap = int(pltpu.get_tpu_info().vmem_capacity_bytes)
    except Exception:
        vmem_cap = 64 * 1024 * 1024          # conservative (v7x physical VMEM)
    vmem_ceiling = (vmem_cap * 3) // 4

    # ---- batch tile: full lanes; >= 2 tiles for large B (v7x megacore) ------
    tb = max(128, (tb // 128) * 128)
    if B <= 128:
        tb_eff = 128                         # lane-dense even for tiny batches
    else:
        half = _round_up(max((B + 1) // 2, 128), 128)
        tb_eff = min(tb, half)               # >= 2 'parallel' steps when B allows
    B_pad = _round_up(B, tb_eff)
    if B_pad != B:
        # padded bags use hashed row 0 (always valid); their columns are sliced off
        mapped = jnp.pad(mapped, ((0, 0), (0, 0), (0, B_pad - B)))
    grid_b = B_pad // tb_eff

    # ---- H tile: whole table resident when it fits, else lane-aligned tiles --
    # counts (TH, TB) int32 live in vregs: cap TH at ~half the 256 KiB vreg
    # file; cap the resident W tile at ~half the VMEM ceiling.
    counts_rows_cap = max(128, (128 * 1024) // (tb_eff * 4))
    w_budget = vmem_ceiling // 2
    if H <= counts_rows_cap and D * H * 4 <= w_budget:
        th, H_pad = H, H                     # single H step, table resident
    else:
        th = min(counts_rows_cap, max(128, w_budget // (2 * D * 4)))
        th = max(128, (th // 128) * 128)
        H_pad = _round_up(H, th)
        # padded table columns are never referenced (ids < H) -> zero counts
        w_t = jnp.pad(w_t, ((0, 0), (0, H_pad - H)))
    grid_h = H_pad // th

    # W's block index is constant when there is a single H step -> single-buffer
    # it (default double-buffering would waste D*H*4 bytes of VMEM).
    if grid_h == 1:
        w_spec = pl.BlockSpec((D, th), lambda i, h: (0, h),
                              pipeline_mode=pl.Buffered(1))
        w_bufs = 1
    else:
        w_spec = pl.BlockSpec((D, th), lambda i, h: (0, h))
        w_bufs = 2

    # Exact VMEM footprint (no double hedging): double-buffered mapped + out,
    # w_bufs copies of the W tile, counts working set, ~2 MiB headroom.
    est = (2 * U * L * tb_eff * 4
           + w_bufs * D * th * 4
           + 2 * D * tb_eff * 4
           + th * tb_eff * 4
           + 2 * 1024 * 1024)
    vmem_limit = int(min(max(est, 16 * 1024 * 1024), vmem_ceiling))

    out_t = pl.pallas_call(
        hash_embedding_bag_kernel,
        out_shape=jax.ShapeDtypeStruct((D, B_pad), jnp.float32),
        grid_spec=pltpu.PrefetchScalarGridSpec(
            num_scalar_prefetch=0,
            grid=(grid_b, grid_h),
            in_specs=[
                pl.BlockSpec((U, L, tb_eff), lambda i, h: (0, 0, i)),
                w_spec,
            ],
            out_specs=pl.BlockSpec((D, tb_eff), lambda i, h: (0, i)),
        ),
        compiler_params=pltpu.CompilerParams(
            dimension_semantics=("parallel", "arbitrary"),
            vmem_limit_bytes=vmem_limit,
        ),
        cost_estimate=pl.CostEstimate(
            # matmul MACs + ~3 VALU ops/elem for the count build (the binding
            # unit whenever D is small relative to ~3*U*L)
            flops=2 * B_pad * H_pad * D + 3 * U * L * H_pad * B_pad,
            transcendentals=0,
            bytes_accessed=D * H_pad * 4 + U * L * B_pad * 4 + D * B_pad * 4,
        ),
    )(mapped, w_t)

    # (D, B_pad) -> (B, D)
    return jnp.transpose(out_t)[:B]


def reference(x, hashed_weight, weight_idx):
    # Pure-JAX reference: sum over updates of embedding_bag(x, W[idx_u], 'sum')
    tables = hashed_weight[weight_idx]          # (U, N, D)
    emb = tables[:, x, :]                       # (U, B, L, D)
    return emb.sum(axis=(0, 2))                 # (B, D)


def make_hash_indices(hashed_weight_size, num_embeddings, update_count):
    # TODO(synk): original module uses xxhash.xxh32 for index generation;
    # replaced with the module's deterministic uni_hash variant (per-update salt).
    idx = np.zeros((update_count, num_embeddings), dtype=np.int32)
    for u in range(update_count):
        for i in range(num_embeddings):
            idx[u, i] = ((i * 32452843 + u * 7919) % 512927357) % hashed_weight_size
    return jnp.asarray(idx, dtype=jnp.int32)


if __name__ == "__main__":
    # Module hyper-params (small, consistent with __init__):
    num_embeddings = 100
    embedding_dim = 32
    compression = 0.5
    update_count = 2
    hashed_weight_size = max(int(num_embeddings * compression), 1)  # 50

    # Example input: bags of fixed length (2-D embedding_bag input, offsets=None)
    B, L = 16, 8

    key = jax.random.PRNGKey(0)
    k_w, k_x = jax.random.split(key)

    bound = np.sqrt(1.0 / num_embeddings)
    hashed_weight = jax.random.uniform(
        k_w, (hashed_weight_size, embedding_dim),
        minval=-bound, maxval=bound, dtype=jnp.float32)

    x = jax.random.randint(k_x, (B, L), 0, num_embeddings, dtype=jnp.int32)

    weight_idx = make_hash_indices(hashed_weight_size, num_embeddings,
                                   update_count)

    out = multi_update_hash_embedding_bag(x, hashed_weight, weight_idx)
    out = jax.block_until_ready(out)

    ref = reference(x, hashed_weight, weight_idx)
    np.testing.assert_allclose(np.asarray(out), np.asarray(ref),
                               rtol=1e-5, atol=1e-5)
    print("KERNEL_OK")
</pallas_src>

<mosaic_0001>
module attributes {stable_mosaic.version = 11 : i64} {
  func.func @hash_embedding_bag_kernel(%arg0: i32, %arg1: i32, %arg2: memref<2x8x128xi32, #tpu.memory_space<vmem>>, %arg3: memref<32x50xf32, #tpu.memory_space<vmem>>, %arg4: memref<32x128xf32, #tpu.memory_space<vmem>>) attributes {dimension_semantics = [#tpu.dimension_semantics<parallel>, #tpu.dimension_semantics<arbitrary>], iteration_bounds = array<i64: 1, 1>, scalar_prefetch = 0 : i64, scratch_operands = 0 : i64, tpu.core_type = #tpu.core_type<tc>, window_params = [{transform_indices = @transform_0, window_bounds = array<i64: 2, 8, 128>}, {pipeline_mode = #tpu.pipeline_mode<synchronous>, transform_indices = @transform_1, window_bounds = array<i64: 32, 50>}, {transform_indices = @transform_2, window_bounds = array<i64: 32, 128>}]} {
    %c0_i32 = arith.constant 0 : i32
    %0 = arith.cmpi eq, %arg1, %c0_i32 : i32
    %1 = arith.extui %0 : i1 to i32
    %c0_i32_0 = arith.constant 0 : i32
    %2 = arith.cmpi ne, %1, %c0_i32_0 : i32
    scf.if %2 {
      %cst_12 = arith.constant 0.000000e+00 : f32
      %98 = vector.broadcast %cst_12 : f32 to vector<32x128xf32>
      %c0_13 = arith.constant 0 : index
      %c0_14 = arith.constant 0 : index
      %99 = vector.load %arg4[%c0_13, %c0_14] : memref<32x128xf32, #tpu.memory_space<vmem>>, vector<32x128xf32>
      tpu.vector_store %arg4[%c0_13, %c0_14], %98 {strides = array<i32>} : memref<32x128xf32, #tpu.memory_space<vmem>>, vector<32x128xf32>,
    } else {
    }
    %3 = tpu.iota {dimensions = array<i32: 0>} : vector<50x128xi32>
    %c50_i32 = arith.constant 50 : i32
    %4 = arith.muli %arg1, %c50_i32 : i32
    %5 = vector.broadcast %4 : i32 to vector<50x128xi32>
    %6 = arith.addi %3, %5 : vector<50x128xi32>
    %c0_i32_1 = arith.constant 0 : i32
    %7 = vector.broadcast %c0_i32_1 : i32 to vector<50x128xi32>
    %c0 = arith.constant 0 : index
    %c0_2 = arith.constant 0 : index
    %c0_3 = arith.constant 0 : index
    %8 = vector.load %arg2[%c0, %c0_2, %c0_3] : memref<2x8x128xi32, #tpu.memory_space<vmem>>, vector<1x8x128xi32>
    %9 = vector.shape_cast %8 : vector<1x8x128xi32> to vector<8x128xi32>
    %10 = vector.extract_strided_slice %9 {offsets = [0, 0], sizes = [1, 128], strides = [1, 1]} : vector<8x128xi32> to vector<1x128xi32>
    %11 = vector.broadcast %10 : vector<1x128xi32> to vector<50x128xi32>
    %12 = arith.cmpi eq, %6, %11 : vector<50x128xi32>
    %13 = arith.extui %12 : vector<50x128xi1> to vector<50x128xi32>
    %14 = arith.addi %7, %13 : vector<50x128xi32>
    %15 = vector.extract_strided_slice %9 {offsets = [1, 0], sizes = [1, 128], strides = [1, 1]} : vector<8x128xi32> to vector<1x128xi32>
    %16 = vector.broadcast %15 : vector<1x128xi32> to vector<50x128xi32>
    %17 = arith.cmpi eq, %6, %16 : vector<50x128xi32>
    %18 = arith.extui %17 : vector<50x128xi1> to vector<50x128xi32>
    %19 = arith.addi %14, %18 : vector<50x128xi32>
    %20 = vector.extract_strided_slice %9 {offsets = [2, 0], sizes = [1, 128], strides = [1, 1]} : vector<8x128xi32> to vector<1x128xi32>
    %21 = vector.broadcast %20 : vector<1x128xi32> to vector<50x128xi32>
    %22 = arith.cmpi eq, %6, %21 : vector<50x128xi32>
    %23 = arith.extui %22 : vector<50x128xi1> to vector<50x128xi32>
    %24 = arith.addi %19, %23 : vector<50x128xi32>
    %25 = vector.extract_strided_slice %9 {offsets = [3, 0], sizes = [1, 128], strides = [1, 1]} : vector<8x128xi32> to vector<1x128xi32>
    %26 = vector.broadcast %25 : vector<1x128xi32> to vector<50x128xi32>
    %27 = arith.cmpi eq, %6, %26 : vector<50x128xi32>
    %28 = arith.extui %27 : vector<50x128xi1> to vector<50x128xi32>
    %29 = arith.addi %24, %28 : vector<50x128xi32>
    %30 = vector.extract_strided_slice %9 {offsets = [4, 0], sizes = [1, 128], strides = [1, 1]} : vector<8x128xi32> to vector<1x128xi32>
    %31 = vector.broadcast %30 : vector<1x128xi32> to vector<50x128xi32>
    %32 = arith.cmpi eq, %6, %31 : vector<50x128xi32>
    %33 = arith.extui %32 : vector<50x128xi1> to vector<50x128xi32>
    %34 = arith.addi %29, %33 : vector<50x128xi32>
    %35 = vector.extract_strided_slice %9 {offsets = [5, 0], sizes = [1, 128], strides = [1, 1]} : vector<8x128xi32> to vector<1x128xi32>
    %36 = vector.broadcast %35 : vector<1x128xi32> to vector<50x128xi32>
    %37 = arith.cmpi eq, %6, %36 : vector<50x128xi32>
    %38 = arith.extui %37 : vector<50x128xi1> to vector<50x128xi32>
    %39 = arith.addi %34, %38 : vector<50x128xi32>
    %40 = vector.extract_strided_slice %9 {offsets = [6, 0], sizes = [1, 128], strides = [1, 1]} : vector<8x128xi32> to vector<1x128xi32>
    %41 = vector.broadcast %40 : vector<1x128xi32> to vector<50x128xi32>
    %42 = arith.cmpi eq, %6, %41 : vector<50x128xi32>
    %43 = arith.extui %42 : vector<50x128xi1> to vector<50x128xi32>
    %44 = arith.addi %39, %43 : vector<50x128xi32>
    %45 = vector.extract_strided_slice %9 {offsets = [7, 0], sizes = [1, 128], strides = [1, 1]} : vector<8x128xi32> to vector<1x128xi32>
    %46 = vector.broadcast %45 : vector<1x128xi32> to vector<50x128xi32>
    %47 = arith.cmpi eq, %6, %46 : vector<50x128xi32>
    %48 = arith.extui %47 : vector<50x128xi1> to vector<50x128xi32>
    %49 = arith.addi %44, %48 : vector<50x128xi32>
    %c1 = arith.constant 1 : index
    %c0_4 = arith.constant 0 : index
    %c0_5 = arith.constant 0 : index
    %50 = vector.load %arg2[%c1, %c0_4, %c0_5] : memref<2x8x128xi32, #tpu.memory_space<vmem>>, vector<1x8x128xi32>
    %51 = vector.shape_cast %50 : vector<1x8x128xi32> to vector<8x128xi32>
    %52 = vector.extract_strided_slice %51 {offsets = [0, 0], sizes = [1, 128], strides = [1, 1]} : vector<8x128xi32> to vector<1x128xi32>
    %53 = vector.broadcast %52 : vector<1x128xi32> to vector<50x128xi32>
    %54 = arith.cmpi eq, %6, %53 : vector<50x128xi32>
    %55 = arith.extui %54 : vector<50x128xi1> to vector<50x128xi32>
    %56 = arith.addi %49, %55 : vector<50x128xi32>
    %57 = vector.extract_strided_slice %51 {offsets = [1, 0], sizes = [1, 128], strides = [1, 1]} : vector<8x128xi32> to vector<1x128xi32>
    %58 = vector.broadcast %57 : vector<1x128xi32> to vector<50x128xi32>
    %59 = arith.cmpi eq, %6, %58 : vector<50x128xi32>
    %60 = arith.extui %59 : vector<50x128xi1> to vector<50x128xi32>
    %61 = arith.addi %56, %60 : vector<50x128xi32>
    %62 = vector.extract_strided_slice %51 {offsets = [2, 0], sizes = [1, 128], strides = [1, 1]} : vector<8x128xi32> to vector<1x128xi32>
    %63 = vector.broadcast %62 : vector<1x128xi32> to vector<50x128xi32>
    %64 = arith.cmpi eq, %6, %63 : vector<50x128xi32>
    %65 = arith.extui %64 : vector<50x128xi1> to vector<50x128xi32>
    %66 = arith.addi %61, %65 : vector<50x128xi32>
    %67 = vector.extract_strided_slice %51 {offsets = [3, 0], sizes = [1, 128], strides = [1, 1]} : vector<8x128xi32> to vector<1x128xi32>
    %68 = vector.broadcast %67 : vector<1x128xi32> to vector<50x128xi32>
    %69 = arith.cmpi eq, %6, %68 : vector<50x128xi32>
    %70 = arith.extui %69 : vector<50x128xi1> to vector<50x128xi32>
    %71 = arith.addi %66, %70 : vector<50x128xi32>
    %72 = vector.extract_strided_slice %51 {offsets = [4, 0], sizes = [1, 128], strides = [1, 1]} : vector<8x128xi32> to vector<1x128xi32>
    %73 = vector.broadcast %72 : vector<1x128xi32> to vector<50x128xi32>
    %74 = arith.cmpi eq, %6, %73 : vector<50x128xi32>
    %75 = arith.extui %74 : vector<50x128xi1> to vector<50x128xi32>
    %76 = arith.addi %71, %75 : vector<50x128xi32>
    %77 = vector.extract_strided_slice %51 {offsets = [5, 0], sizes = [1, 128], strides = [1, 1]} : vector<8x128xi32> to vector<1x128xi32>
    %78 = vector.broadcast %77 : vector<1x128xi32> to vector<50x128xi32>
    %79 = arith.cmpi eq, %6, %78 : vector<50x128xi32>
    %80 = arith.extui %79 : vector<50x128xi1> to vector<50x128xi32>
    %81 = arith.addi %76, %80 : vector<50x128xi32>
    %82 = vector.extract_strided_slice %51 {offsets = [6, 0], sizes = [1, 128], strides = [1, 1]} : vector<8x128xi32> to vector<1x128xi32>
    %83 = vector.broadcast %82 : vector<1x128xi32> to vector<50x128xi32>
    %84 = arith.cmpi eq, %6, %83 : vector<50x128xi32>
    %85 = arith.extui %84 : vector<50x128xi1> to vector<50x128xi32>
    %86 = arith.addi %81, %85 : vector<50x128xi32>
    %87 = vector.extract_strided_slice %51 {offsets = [7, 0], sizes = [1, 128], strides = [1, 1]} : vector<8x128xi32> to vector<1x128xi32>
    %88 = vector.broadcast %87 : vector<1x128xi32> to vector<50x128xi32>
    %89 = arith.cmpi eq, %6, %88 : vector<50x128xi32>
    %90 = arith.extui %89 : vector<50x128xi1> to vector<50x128xi32>
    %91 = arith.addi %86, %90 : vector<50x128xi32>
    %c0_6 = arith.constant 0 : index
    %c0_7 = arith.constant 0 : index
    %92 = vector.load %arg4[%c0_6, %c0_7] : memref<32x128xf32, #tpu.memory_space<vmem>>, vector<32x128xf32>
    %c0_8 = arith.constant 0 : index
    %c0_9 = arith.constant 0 : index
    %93 = vector.load %arg3[%c0_8, %c0_9] : memref<32x50xf32, #tpu.memory_space<vmem>>, vector<32x50xf32>
    %94 = arith.sitofp %91 : vector<50x128xi32> to vector<50x128xf32>
    %cst = arith.constant dense<0.000000e+00> : vector<32x128xf32>
    %95 = tpu.matmul %93, %94, %cst {dimension_numbers = #tpu.dot_dimension_numbers<[1], [0], [0], [1], [0, 0, 1, 1], [], []>} : vector<32x50xf32>, vector<50x128xf32>, vector<32x128xf32> -> vector<32x128xf32>
    %96 = arith.addf %92, %95 : vector<32x128xf32>
    %c0_10 = arith.constant 0 : index
    %c0_11 = arith.constant 0 : index
    %97 = vector.load %arg4[%c0_10, %c0_11] : memref<32x128xf32, #tpu.memory_space<vmem>>, vector<32x128xf32>
    tpu.vector_store %arg4[%c0_10, %c0_11], %96 {strides = array<i32>} : memref<32x128xf32, #tpu.memory_space<vmem>>, vector<32x128xf32>,
    return
  }
  func.func @transform_0(%arg0: i32, %arg1: i32) -> (i32, i32, i32) {
    %c0_i32 = arith.constant 0 : i32
    %c0_i32_0 = arith.constant 0 : i32
    %c0_i32_1 = arith.constant 0 : i32
    return %c0_i32, %c0_i32_0, %arg0 : i32, i32, i32
  }
  func.func @transform_1(%arg0: i32, %arg1: i32) -> (i32, i32) {
    %c0_i32 = arith.constant 0 : i32
    %c0_i32_0 = arith.constant 0 : i32
    return %c0_i32, %arg1 : i32, i32
  }
  func.func @transform_2(%arg0: i32, %arg1: i32) -> (i32, i32) {
    %c0_i32 = arith.constant 0 : i32
    %c0_i32_0 = arith.constant 0 : i32
    return %c0_i32, %arg0 : i32, i32
  }
}

</mosaic_0001>

<bundles_post_ra>
// kernel: tpu_custom_call.1
= control target key start
LH: loop header
LB: loop body
LE: loop exit
PB: predicated region body
PF: predicated region fallthrough
CT: control target
= control target key end

     0   :  { %7 = vsyncpa [#allocation3], 0  ;;  %s1215_s0 = inlined_call_operand.hbm [shape: s32[2,8,128], index: 0, kind: input, shape index: {}]   ;;  %s1216_s1 = inlined_call_operand.hbm [shape: f32[32,50], index: 1, kind: input, shape index: {}]   ;;  %s1217_s2 = inlined_call_operand.hbm [shape: f32[32,128], index: 2, kind: output, shape index: {}]  }
   0x1   :  { %8 = vsyncpa [#allocation6], 0 }
   0x2   :  { %9 = vsyncpa [#allocation4], 0  ;;  %s727_s9 = smov [#allocation2]  }
   0x3   :  { %s15_s10 = sshll.u32 %s727_s9, 4  ;;  %s16_s10 = int_to_ptr.vmem [resolvable:$true] %s15_s10 }
   0x4   :  { %s669_s11 = scalar_lea.vmem %s16_s10, 256  ;;  %p674_p1 = scmp.lt.s32.totalorder %s16_s10, %s16_s10 }
   0x5   :  { %p670_p0 = scmp.ne.s32.totalorder %s16_s10, %s669_s11  ;;  %p675_p2 = scmp.lt.s32.totalorder %s669_s11, %s669_s11 }
   0x7   :  { %p676_p3 = por %p675_p2, %p674_p1 }
   0x9   :  { %p677_p4 = pnand %p676_p3, %p670_p0 }
   0xb   :  { %680 = shalt.err (!%p677_p4)
}
   0xc   :  { %s728_s12 = smov 128   ;;  %s729_s13 = smov 8  }
   0xd   :  { %21 = dma.hbm_to_vmem [thread:$0]  %s1215_s0, 256, %s16_s10, [#allocation3], %s728_s12, %s728_s12, %s729_s13  }
   0xe   :  { %s730_s16 = smov [#allocation5]  }
   0xf   :  { %s27_s17 = sshll.u32 %s730_s16, 4  ;;  %s28_s17 = int_to_ptr.vmem [resolvable:$true] %s27_s17 }
  0x10   :  { %s689_s18 = scalar_lea.vmem %s28_s17, 512  ;;  %p694_p6 = scmp.lt.s32.totalorder %s28_s17, %s28_s17 }
  0x11   :  { %p690_p5 = scmp.ne.s32.totalorder %s28_s17, %s689_s18  ;;  %p695_p7 = scmp.lt.s32.totalorder %s689_s18, %s689_s18 }
  0x13   :  { %p696_p8 = por %p695_p7, %p694_p6 }
  0x15   :  { %p697_p9 = pnand %p696_p8, %p690_p5 }
  0x17   :  { %700 = shalt.err (!%p697_p9)
}
  0x18   :  { %33 = dma.hbm_to_vmem [thread:$0]  %s1216_s1, 512, %s28_s17, [#allocation6], %s728_s12, %s728_s12, %s729_s13  }
  0x19   :  { %721 = dma.done.wait [#allocation3], 256  }
  0x1a   :  { %722 = vsyncadd [#allocation3], 4294967040 }
  0x1b   :  { %723 = dma.done.wait [#allocation6], 512  }
  0x1c   :  { %724 = vsyncadd [#allocation6], 4294966784  ;;  %v48_v0 = vlaneseq  ;;  %vm476_vm0 = vcmask 408576   ;;  %v65_v10 = vld [vmem:[#allocation2] sm:$0xff]  ;;  %v465_v12 = vld [vmem:[#allocation5] sm:$0xff]  ;;  %v731_v21 = vmov 0  }
  0x1d   :  { %634 = vmatprep.mubr.msk.f32.mxu0 %vm476_vm0, %v465_v12  ;;  %v467_v17 = vld [vmem:[#allocation5 + $0x10] sm:$0xff]  ;;  %v260_v26 = vld [vmem:[#allocation2 + $0x8] sm:$0xff]  ;;  %s732_s0 = smov [#allocation7]  }
  0x1e   :  { %v760_v1 = vshrl.u32 %v48_v0, 7  ;;  %637 = vmatprep.mubr.msk.f32.mxu1 %vm476_vm0, %v467_v17  ;;  %s591_s1 = sshll.u32 %s732_s0, 4  ;;  %s592_s1 = int_to_ptr.vmem [resolvable:$true] %s591_s1 }
  0x1f   :  { %s701_s21 = scalar_lea.vmem %s592_s1, 512  ;;  %p706_p11 = scmp.lt.s32.totalorder %s592_s1, %s592_s1 }
  0x20   :  { %v68_v2 = vsub.s32 0, %v760_v1  ;;  %v86_v3 = vsub.s32 1, %v760_v1  ;;  %v111_v4 = vsub.s32 2, %v760_v1  ;;  %v136_v5 = vsub.s32 3, %v760_v1  ;;  %p702_p10 = scmp.ne.s32.totalorder %s592_s1, %s701_s21  ;;  %p707_p12 = scmp.lt.s32.totalorder %s701_s21, %s701_s21 }
  0x21   :  { %v161_v6 = vsub.s32 4, %v760_v1  ;;  %v186_v7 = vsub.s32 5, %v760_v1  ;;  %v211_v8 = vsub.s32 6, %v760_v1  ;;  %v770_v9 = vadd.s32 48, %v760_v1 }
  0x22   :  { %v236_v11 = vsub.s32 7, %v760_v1  ;;  %v773_v13 = vrot.slane %v65_v10, %v68_v2  ;;  %v775_v14 = vrot.slane %v65_v10, %v86_v3  ;;  %v777_v15 = vrot.slane %v65_v10, %v111_v4  ;;  %p708_p13 = por %p707_p12, %p706_p11 }
  0x23   :  { %v779_v16 = vrot.slane %v65_v10, %v136_v5  ;;  %v782_v18 = vrot.slane %v65_v10, %v161_v6  ;;  %v784_v19 = vrot.slane %v65_v10, %v186_v7  ;;  %v786_v20 = vrot.slane %v65_v10, %v211_v8 }
  0x24   :  { %vm76_vm1 = vcmp.eq.s32.totalorder %v770_v9, %v773_v13  ;;  %vm94_vm2 = vcmp.eq.s32.totalorder %v770_v9, %v775_v14  ;;  %vm119_vm3 = vcmp.eq.s32.totalorder %v770_v9, %v777_v15  ;;  %v800_v25 = vrot.slane %v65_v10, %v236_v11  ;;  %p709_p0 = pnand %p708_p13, %p702_p10 }
  0x25   :  { %vm144_vm4 = vcmp.eq.s32.totalorder %v770_v9, %v779_v16  ;;  %v83_v22 = vsel %vm76_vm1, 1, %v731_v21  ;;  %v101_v23 = vsel %vm94_vm2, 1, %v731_v21  ;;  %v126_v24 = vsel %vm119_vm3, 1, %v731_v21 }
  0x26   :  { %v108_v27 = vadd.s32 %v101_v23, %v83_v22  ;;  %vm169_vm5 = vcmp.eq.s32.totalorder %v770_v9, %v782_v18  ;;  %v151_v28 = vsel %vm144_vm4, 1, %v731_v21  ;;  %vm194_vm6 = vcmp.eq.s32.totalorder %v770_v9, %v784_v19 }
  0x27   :  { %v807_v30 = vrot.slane %v260_v26, %v68_v2  ;;  %v809_v31 = vrot.slane %v260_v26, %v86_v3  ;;  %v176_v32 = vsel %vm169_vm5, 1, %v731_v21  ;;  %vm219_vm7 = vcmp.eq.s32.totalorder %v770_v9, %v786_v20 }
  0x28   :  { %v133_v29 = vadd.s32 %v126_v24, %v108_v27  ;;  %vm244_vm8 = vcmp.eq.s32.totalorder %v770_v9, %v800_v25  ;;  %v817_v33 = vadd.s32 40, %v760_v1  ;;  %v820_v35 = vadd.s32 32, %v760_v1 }
  0x29   :  { %v823_v36 = vadd.s32 24, %v760_v1  ;;  %v826_v37 = vadd.s32 16, %v760_v1  ;;  %v201_v38 = vsel %vm194_vm6, 1, %v731_v21  ;;  %vm271_vm9 = vcmp.eq.s32.totalorder %v770_v9, %v807_v30 }
  0x2a   :  { %v158_v34 = vadd.s32 %v151_v28, %v133_v29  ;;  %vm296_vm10 = vcmp.eq.s32.totalorder %v770_v9, %v809_v31  ;;  %v833_v39 = vrot.slane %v260_v26, %v111_v4  ;;  %v226_v41 = vsel %vm219_vm7, 1, %v731_v21 }
  0x2b   :  { %v251_v42 = vsel %vm244_vm8, 1, %v731_v21  ;;  %v838_v43 = vadd.s32 8, %v760_v1  ;;  %v840_v44 = vrot.slane %v260_v26, %v136_v5  ;;  %v842_v45 = vrot.slane %v260_v26, %v161_v6 }
  0x2c   :  { %v183_v40 = vadd.s32 %v176_v32, %v158_v34  ;;  %v844_v46 = vrot.slane %v260_v26, %v186_v7  ;;  %v846_v47 = vrot.slane %v260_v26, %v211_v8  ;;  %v278_v49 = vsel %vm271_vm9, 1, %v731_v21 }
  0x2d   :  { %v303_v50 = vsel %vm296_vm10, 1, %v731_v21  ;;  %vm75_vm11 = vcmp.eq.s32.totalorder %v817_v33, %v773_v13  ;;  %vm321_vm12 = vcmp.eq.s32.totalorder %v770_v9, %v833_v39  ;;  %vm93_vm13 = vcmp.eq.s32.totalorder %v817_v33, %v775_v14 }
  0x2e   :  { %v208_v48 = vadd.s32 %v201_v38, %v183_v40  ;;  %v82_v51 = vsel %vm75_vm11, 1, %v731_v21  ;;  %vm118_vm14 = vcmp.eq.s32.totalorder %v817_v33, %v777_v15  ;;  %v859_v53 = vrot.slane %v260_v26, %v236_v11 }
  0x2f   :  { %v100_v54 = vsel %vm93_vm13, 1, %v731_v21  ;;  %v125_v55 = vsel %vm118_vm14, 1, %v731_v21  ;;  %vm346_vm15 = vcmp.eq.s32.totalorder %v770_v9, %v840_v44  ;;  %vm143_vm1 = vcmp.eq.s32.totalorder %v817_v33, %v779_v16 }
  0x30   :  { %v233_v52 = vadd.s32 %v226_v41, %v208_v48  ;;  %v107_v56 = vadd.s32 %v100_v54, %v82_v51  ;;  %vm168_vm2 = vcmp.eq.s32.totalorder %v817_v33, %v782_v18  ;;  %v328_v58 = vsel %vm321_vm12, 1, %v731_v21 }
  0x31   :  { %vm371_vm3 = vcmp.eq.s32.totalorder %v770_v9, %v842_v45  ;;  %v150_v59 = vsel %vm143_vm1, 1, %v731_v21  ;;  %vm396_vm4 = vcmp.eq.s32.totalorder %v770_v9, %v844_v46  ;;  %vm421_vm5 = vcmp.eq.s32.totalorder %v770_v9, %v846_v47 }
  0x32   :  { %v258_v57 = vadd.s32 %v251_v42, %v233_v52  ;;  %v132_v60 = vadd.s32 %v125_v55, %v107_v56  ;;  %vm193_vm6 = vcmp.eq.s32.totalorder %v817_v33, %v784_v19  ;;  %vm446_vm7 = vcmp.eq.s32.totalorder %v770_v9, %v859_v53 }
  0x33   :  { %v175_v62 = vsel %vm168_vm2, 1, %v731_v21  ;;  %vm218_vm8 = vcmp.eq.s32.totalorder %v817_v33, %v786_v20  ;;  %v353_v63 = vsel %vm346_vm15, 1, %v731_v21  ;;  %vm243_vm9 = vcmp.eq.s32.totalorder %v817_v33, %v800_v25 }
  0x34   :  { %v285_v61 = vadd.s32 %v278_v49, %v258_v57  ;;  %v157_v0 = vadd.s32 %v150_v59, %v132_v60  ;;  %vm270_vm10 = vcmp.eq.s32.totalorder %v817_v33, %v807_v30  ;;  %v378_v3 = vsel %vm371_vm3, 1, %v731_v21 }
  0x35   :  { %v403_v4 = vsel %vm396_vm4, 1, %v731_v21  ;;  %v200_v5 = vsel %vm193_vm6, 1, %v731_v21  ;;  %v428_v6 = vsel %vm421_vm5, 1, %v731_v21  ;;  %v453_v7 = vsel %vm446_vm7, 1, %v731_v21 }
  0x36   :  { %v310_v2 = vadd.s32 %v303_v50, %v285_v61  ;;  %v182_v8 = vadd.s32 %v175_v62, %v157_v0  ;;  %v225_v9 = vsel %vm218_vm8, 1, %v731_v21  ;;  %v250_v11 = vsel %vm243_vm9, 1, %v731_v21 }
  0x37   :  { %v277_v12 = vsel %vm270_vm10, 1, %v731_v21  ;;  %vm295_vm11 = vcmp.eq.s32.totalorder %v817_v33, %v809_v31  ;;  %vm320_vm12 = vcmp.eq.s32.totalorder %v817_v33, %v833_v39  ;;  %vm74_vm13 = vcmp.eq.s32.totalorder %v820_v35, %v773_v13 }
  0x38   :  { %v335_v10 = vadd.s32 %v328_v58, %v310_v2  ;;  %v207_v17 = vadd.s32 %v200_v5, %v182_v8  ;;  %vm92_vm14 = vcmp.eq.s32.totalorder %v820_v35, %v775_v14  ;;  %vm345_vm15 = vcmp.eq.s32.totalorder %v817_v33, %v840_v44 }
  0x39   :  { %v81_v23 = vsel %vm74_vm13, 1, %v731_v21  ;;  %v99_v24 = vsel %vm92_vm14, 1, %v731_v21  ;;  %vm489_vm1 = vcmask 1041408   ;;  %vm117_vm2 = vcmp.eq.s32.totalorder %v820_v35, %v777_v15 }
  0x3a   :  { %v360_v22 = vadd.s32 %v353_v63, %v335_v10  ;;  %v232_v26 = vadd.s32 %v225_v9, %v207_v17  ;;  %v106_v27 = vadd.s32 %v99_v24, %v81_v23  ;;  %vm142_vm3 = vcmp.eq.s32.totalorder %v820_v35, %v779_v16 }
  0x3b   :  { %v124_v29 = vsel %vm117_vm2, 1, %v731_v21  ;;  %v149_v32 = vsel %vm142_vm3, 1, %v731_v21  ;;  %vm167_vm4 = vcmp.eq.s32.totalorder %v820_v35, %v782_v18  ;;  %v302_v38 = vsel %vm295_vm11, 1, %v731_v21 }
  0x3c   :  { %v385_v28 = vadd.s32 %v378_v3, %v360_v22  ;;  %v257_v34 = vadd.s32 %v250_v11, %v232_v26  ;;  %v131_v40 = vadd.s32 %v124_v29, %v106_v27  ;;  %vm192_vm5 = vcmp.eq.s32.totalorder %v820_v35, %v784_v19 }
  0x3d   :  { %v327_v42 = vsel %vm320_vm12, 1, %v731_v21  ;;  %v352_v48 = vsel %vm345_vm15, 1, %v731_v21  ;;  %v174_v49 = vsel %vm167_vm4, 1, %v731_v21  ;;  %vm370_vm6 = vcmp.eq.s32.totalorder %v817_v33, %v842_v45 }
  0x3e   :  { %v410_v41 = vadd.s32 %v403_v4, %v385_v28  ;;  %v284_v50 = vadd.s32 %v277_v12, %v257_v34  ;;  %v156_v51 = vadd.s32 %v149_v32, %v131_v40  ;;  %vm217_vm7 = vcmp.eq.s32.totalorder %v820_v35, %v786_v20 }
  0x3f   :  { %vm395_vm8 = vcmp.eq.s32.totalorder %v817_v33, %v844_v46  ;;  %vm420_vm9 = vcmp.eq.s32.totalorder %v817_v33, %v846_v47  ;;  %v199_v54 = vsel %vm192_vm5, 1, %v731_v21  ;;  %vm445_vm10 = vcmp.eq.s32.totalorder %v817_v33, %v859_v53 }
  0x40   :  { %v435_v52 = vadd.s32 %v428_v6, %v410_v41  ;;  %v309_v55 = vadd.s32 %v302_v38, %v284_v50  ;;  %v181_v56 = vadd.s32 %v174_v49, %v156_v51  ;;  %vm242_vm11 = vcmp.eq.s32.totalorder %v820_v35, %v800_v25 }
  0x41   :  { %v377_v58 = vsel %vm370_vm6, 1, %v731_v21  ;;  %v224_v59 = vsel %vm217_vm7, 1, %v731_v21  ;;  %vm269_vm12 = vcmp.eq.s32.totalorder %v820_v35, %v807_v30  ;;  %v402_v61 = vsel %vm395_vm8, 1, %v731_v21 }
  0x42   :  { %v460_v57 = vadd.s32 %v453_v7, %v435_v52  ;;  %v334_v60 = vadd.s32 %v327_v42, %v309_v55  ;;  %v206_v62 = vadd.s32 %v199_v54, %v181_v56  ;;  %vm294_vm13 = vcmp.eq.s32.totalorder %v820_v35, %v809_v31 }
  0x43   :  { %v427_v63 = vsel %vm420_vm9, 1, %v731_v21  ;;  %v452_v0 = vsel %vm445_vm10, 1, %v731_v21  ;;  %v249_v2 = vsel %vm242_vm11, 1, %v731_v21  ;;  %v276_v5 = vsel %vm269_vm12, 1, %v731_v21 }
  0x44   :  { %v475_v33 = vcvt.s32.f32 %v460_v57  ;;  %v359_v3 = vadd.s32 %v352_v48, %v334_v60  ;;  %v231_v4 = vadd.s32 %v224_v59, %v206_v62  ;;  %vm319_vm14 = vcmp.eq.s32.totalorder %v820_v35, %v833_v39 }
  0x45   :  { %v301_v6 = vsel %vm294_vm13, 1, %v731_v21  ;;  %vm73_vm15 = vcmp.eq.s32.totalorder %v823_v36, %v773_v13  ;;  %vm91_vm2 = vcmp.eq.s32.totalorder %v823_v36, %v775_v14  ;;  %vm116_vm3 = vcmp.eq.s32.totalorder %v823_v36, %v777_v15 }
  0x46   :  { %620 = vmatprep.subr.msk.mxu0 %vm489_vm1, %v475_v33  ;;  %640 = vmatprep.subr.msk.mxu1 %vm489_vm1, %v475_v33  ;;  %v384_v7 = vadd.s32 %v377_v58, %v359_v3  ;;  %v256_v8 = vadd.s32 %v249_v2, %v231_v4  ;;  %v80_v9 = vsel %vm73_vm15, 1, %v731_v21  ;;  %v98_v10 = vsel %vm91_vm2, 1, %v731_v21 }
  0x47   :  { %621 = vmatpush3.msk.msra.mxu0 %vm489_vm1, %v475_v33  ;;  %647 = vmatpush3.msk.msra.mxu1 %vm489_vm1, %v475_v33  ;;  %v105_v11 = vadd.s32 %v98_v10, %v80_v9  ;;  %v123_v12 = vsel %vm116_vm3, 1, %v731_v21  ;;  %vm141_vm4 = vcmp.eq.s32.totalorder %v823_v36, %v779_v16  ;;  %vm166_vm5 = vcmp.eq.s32.totalorder %v823_v36, %v782_v18 }
  0x48   :  { %v409_v17 = vadd.s32 %v402_v61, %v384_v7  ;;  %v283_v22 = vadd.s32 %v276_v5, %v256_v8  ;;  %vm344_vm1 = vcmp.eq.s32.totalorder %v820_v35, %v840_v44  ;;  %v148_v23 = vsel %vm141_vm4, 1, %v731_v21 }
  0x49   :  { %v326_v24 = vsel %vm319_vm14, 1, %v731_v21  ;;  %vm369_vm6 = vcmp.eq.s32.totalorder %v820_v35, %v842_v45  ;;  %v130_v26 = vadd.s32 %v123_v12, %v105_v11  ;;  %vm191_vm7 = vcmp.eq.s32.totalorder %v823_v36, %v784_v19 }
  0x4a   :  { %v434_v27 = vadd.s32 %v427_v63, %v409_v17  ;;  %v308_v28 = vadd.s32 %v301_v6, %v283_v22  ;;  %vm394_vm8 = vcmp.eq.s32.totalorder %v820_v35, %v844_v46  ;;  %v173_v29 = vsel %vm166_vm5, 1, %v731_v21 }
  0x4b   :  { %v351_v32 = vsel %vm344_vm1, 1, %v731_v21  ;;  %vm419_vm9 = vcmp.eq.s32.totalorder %v820_v35, %v846_v47  ;;  %v155_v34 = vadd.s32 %v148_v23, %v130_v26  ;;  %vm216_vm10 = vcmp.eq.s32.totalorder %v823_v36, %v786_v20 }
  0x4c   :  { %v459_v38 = vadd.s32 %v452_v0, %v434_v27  ;;  %v333_v40 = vadd.s32 %v326_v24, %v308_v28  ;;  %vm444_vm11 = vcmp.eq.s32.totalorder %v820_v35, %v859_v53  ;;  %v198_v41 = vsel %vm191_vm7, 1, %v731_v21 }
  0x4d   :  { %v376_v42 = vsel %vm369_vm6, 1, %v731_v21  ;;  %v401_v48 = vsel %vm394_vm8, 1, %v731_v21  ;;  %v180_v49 = vadd.s32 %v173_v29, %v155_v34  ;;  %vm241_vm12 = vcmp.eq.s32.totalorder %v823_v36, %v800_v25 }
  0x4e   :  { %v474_v50 = vcvt.s32.f32 %v459_v38  ;;  %v358_v51 = vadd.s32 %v351_v32, %v333_v40  ;;  %v223_v52 = vsel %vm216_vm10, 1, %v731_v21  ;;  %vm268_vm13 = vcmp.eq.s32.totalorder %v823_v36, %v807_v30 }
  0x4f   :  { %v426_v54 = vsel %vm419_vm9, 1, %v731_v21  ;;  %v451_v35 = vsel %vm444_vm11, 1, %v731_v21  ;;  %v205_v55 = vadd.s32 %v198_v41, %v180_v49  ;;  %vm293_vm14 = vcmp.eq.s32.totalorder %v823_v36, %v809_v31 }
  0x50   :  { %622 = vmatprep.subr.mxu0 %v474_v50  ;;  %641 = vmatprep.subr.mxu1 %v474_v50  ;;  %v383_v56 = vadd.s32 %v376_v42, %v358_v51  ;;  %v248_v57 = vsel %vm241_vm12, 1, %v731_v21  ;;  %vm318_vm15 = vcmp.eq.s32.totalorder %v823_v36, %v833_v39  ;;  %vm343_vm2 = vcmp.eq.s32.totalorder %v823_v36, %v840_v44 }
  0x51   :  { %623 = vmatpush3.msra.mxu0 %v474_v50  ;;  %648 = vmatpush3.msra.mxu1 %v474_v50  ;;  %v230_v58 = vadd.s32 %v223_v52, %v205_v55  ;;  %v275_v59 = vsel %vm268_vm13, 1, %v731_v21  ;;  %vm72_vm3 = vcmp.eq.s32.totalorder %v826_v37, %v773_v13  ;;  %vm90_vm4 = vcmp.eq.s32.totalorder %v826_v37, %v775_v14 }
  0x52   :  { %v408_v60 = vadd.s32 %v401_v48, %v383_v56  ;;  %v79_v61 = vsel %vm72_vm3, 1, %v731_v21  ;;  %v97_v62 = vsel %vm90_vm4, 1, %v731_v21  ;;  %vm115_vm5 = vcmp.eq.s32.totalorder %v826_v37, %v777_v15 }
  0x53   :  { %v255_v33 = vadd.s32 %v248_v57, %v230_v58  ;;  %v104_v63 = vadd.s32 %v97_v62, %v79_v61  ;;  %v122_v0 = vsel %vm115_vm5, 1, %v731_v21  ;;  %vm140_vm1 = vcmp.eq.s32.totalorder %v826_v37, %v779_v16 }
  0x54   :  { %v433_v2 = vadd.s32 %v426_v54, %v408_v60  ;;  %v300_v3 = vsel %vm293_vm14, 1, %v731_v21  ;;  %v147_v4 = vsel %vm140_vm1, 1, %v731_v21  ;;  %vm165_vm6 = vcmp.eq.s32.totalorder %v826_v37, %v782_v18 }
  0x55   :  { %v282_v5 = vadd.s32 %v275_v59, %v255_v33  ;;  %vm368_vm7 = vcmp.eq.s32.totalorder %v823_v36, %v842_v45  ;;  %v129_v6 = vadd.s32 %v122_v0, %v104_v63  ;;  %vm190_vm8 = vcmp.eq.s32.totalorder %v826_v37, %v784_v19 }
  0x56   :  { %v458_v7 = vadd.s32 %v451_v35, %v433_v2  ;;  %v325_v8 = vsel %vm318_vm15, 1, %v731_v21  ;;  %v350_v9 = vsel %vm343_vm2, 1, %v731_v21  ;;  %v172_v10 = vsel %vm165_vm6, 1, %v731_v21 }
  0x57   :  { %v307_v11 = vadd.s32 %v300_v3, %v282_v5  ;;  %vm393_vm9 = vcmp.eq.s32.totalorder %v823_v36, %v844_v46  ;;  %v154_v12 = vadd.s32 %v147_v4, %v129_v6  ;;  %vm215_vm10 = vcmp.eq.s32.totalorder %v826_v37, %v786_v20 }
  0x58   :  { %v473_v17 = vcvt.s32.f32 %v458_v7  ;;  %vm418_vm11 = vcmp.eq.s32.totalorder %v823_v36, %v846_v47  ;;  %vm443_vm12 = vcmp.eq.s32.totalorder %v823_v36, %v859_v53  ;;  %v197_v22 = vsel %vm190_vm8, 1, %v731_v21 }
  0x59   :  { %v332_v23 = vadd.s32 %v325_v8, %v307_v11  ;;  %v179_v24 = vadd.s32 %v172_v10, %v154_v12  ;;  %vm240_vm13 = vcmp.eq.s32.totalorder %v826_v37, %v800_v25  ;;  %vm267_vm14 = vcmp.eq.s32.totalorder %v826_v37, %v807_v30 }
  0x5a   :  { %624 = vmatprep.subr.mxu0 %v473_v17  ;;  %642 = vmatprep.subr.mxu1 %v473_v17  ;;  %v375_v26 = vsel %vm368_vm7, 1, %v731_v21  ;;  %v222_v27 = vsel %vm215_vm10, 1, %v731_v21  ;;  %v400_v29 = vsel %vm393_vm9, 1, %v731_v21  ;;  %v425_v32 = vsel %vm418_vm11, 1, %v731_v21 }
  0x5b   :  { %625 = vmatpush3.msra.mxu0 %v473_v17  ;;  %649 = vmatpush3.msra.mxu1 %v473_v17  ;;  %v357_v28 = vadd.s32 %v350_v9, %v332_v23  ;;  %v204_v34 = vadd.s32 %v197_v22, %v179_v24  ;;  %v450_v38 = vsel %vm443_vm12, 1, %v731_v21  ;;  %v247_v40 = vsel %vm240_vm13, 1, %v731_v21 }
  0x5c   :  { %v274_v41 = vsel %vm267_vm14, 1, %v731_v21  ;;  %vm71_vm15 = vcmp.eq.s32.totalorder %v838_v43, %v773_v13  ;;  %vm292_vm2 = vcmp.eq.s32.totalorder %v826_v37, %v809_v31  ;;  %vm317_vm3 = vcmp.eq.s32.totalorder %v826_v37, %v833_v39 }
  0x5d   :  { %v382_v42 = vadd.s32 %v375_v26, %v357_v28  ;;  %v229_v48 = vadd.s32 %v222_v27, %v204_v34  ;;  %v78_v49 = vsel %vm71_vm15, 1, %v731_v21  ;;  %vm89_vm4 = vcmp.eq.s32.totalorder %v838_v43, %v775_v14 }
  0x5e   :  { %vm114_vm5 = vcmp.eq.s32.totalorder %v838_v43, %v777_v15  ;;  %vm139_vm1 = vcmp.eq.s32.totalorder %v838_v43, %v779_v16  ;;  %v96_v51 = vsel %vm89_vm4, 1, %v731_v21  ;;  %v299_v54 = vsel %vm292_vm2, 1, %v731_v21 }
  0x5f   :  { %v407_v36 = vadd.s32 %v400_v29, %v382_v42  ;;  %v254_v50 = vadd.s32 %v247_v40, %v229_v48  ;;  %v121_v52 = vsel %vm114_vm5, 1, %v731_v21  ;;  %vm342_vm6 = vcmp.eq.s32.totalorder %v826_v37, %v840_v44 }
  0x60   :  { %v103_v35 = vadd.s32 %v96_v51, %v78_v49  ;;  %vm164_vm7 = vcmp.eq.s32.totalorder %v838_v43, %v782_v18  ;;  %v324_v57 = vsel %vm317_vm3, 1, %v731_v21  ;;  %v146_v58 = vsel %vm139_vm1, 1, %v731_v21 }
  0x61   :  { %v432_v55 = vadd.s32 %v425_v32, %v407_v36  ;;  %v281_v56 = vadd.s32 %v274_v41, %v254_v50  ;;  %vm367_vm8 = vcmp.eq.s32.totalorder %v826_v37, %v842_v45  ;;  %vm392_vm9 = vcmp.eq.s32.totalorder %v826_v37, %v844_v46 }
  0x62   :  { %v128_v59 = vadd.s32 %v121_v52, %v103_v35  ;;  %vm189_vm10 = vcmp.eq.s32.totalorder %v838_v43, %v784_v19  ;;  %v349_v62 = vsel %vm342_vm6, 1, %v731_v21  ;;  %v171_v33 = vsel %vm164_vm7, 1, %v731_v21 }
  0x63   :  { %v457_v60 = vadd.s32 %v450_v38, %v432_v55  ;;  %v306_v61 = vadd.s32 %v299_v54, %v281_v56  ;;  %vm417_vm11 = vcmp.eq.s32.totalorder %v826_v37, %v846_v47  ;;  %vm442_vm12 = vcmp.eq.s32.totalorder %v826_v37, %v859_v53 }
  0x64   :  { %v153_v63 = vadd.s32 %v146_v58, %v128_v59  ;;  %vm214_vm13 = vcmp.eq.s32.totalorder %v838_v43, %v786_v20  ;;  %v196_v3 = vsel %vm189_vm10, 1, %v731_v21  ;;  %vm239_vm14 = vcmp.eq.s32.totalorder %v838_v43, %v800_v25 }
  0x65   :  { %v472_v0 = vcvt.s32.f32 %v457_v60  ;;  %v331_v2 = vadd.s32 %v324_v57, %v306_v61  ;;  %v374_v4 = vsel %vm367_vm8, 1, %v731_v21  ;;  %vm266_vm15 = vcmp.eq.s32.totalorder %v838_v43, %v807_v30 }
  0x66   :  { %v178_v5 = vadd.s32 %v171_v33, %v153_v63  ;;  %v399_v7 = vsel %vm392_vm9, 1, %v731_v21  ;;  %v221_v8 = vsel %vm214_vm13, 1, %v731_v21  ;;  %v424_v9 = vsel %vm417_vm11, 1, %v731_v21 }
  0x67   :  { %626 = vmatprep.subr.mxu0 %v472_v0  ;;  %643 = vmatprep.subr.mxu1 %v472_v0  ;;  %v356_v6 = vadd.s32 %v349_v62, %v331_v2  ;;  %v449_v10 = vsel %vm442_vm12, 1, %v731_v21  ;;  %v246_v12 = vsel %vm239_vm14, 1, %v731_v21  ;;  %v273_v22 = vsel %vm266_vm15, 1, %v731_v21 }
  0x68   :  { %627 = vmatpush3.msra.mxu0 %v472_v0  ;;  %650 = vmatpush3.msra.mxu1 %v472_v0  ;;  %v203_v11 = vadd.s32 %v196_v3, %v178_v5  ;;  %vm291_vm2 = vcmp.eq.s32.totalorder %v838_v43, %v809_v31  ;;  %vm70_vm3 = vcmp.eq.s32.totalorder %v760_v1, %v773_v13 }
  0x69   :  { %v381_v17 = vadd.s32 %v374_v4, %v356_v6  ;;  %v77_v24 = vsel %vm70_vm3, 1, %v731_v21  ;;  %vm88_vm4 = vcmp.eq.s32.totalorder %v760_v1, %v775_v14  ;;  %vm113_vm5 = vcmp.eq.s32.totalorder %v760_v1, %v777_v15 }
  0x6a   :  { %v228_v23 = vadd.s32 %v221_v8, %v203_v11  ;;  %v95_v26 = vsel %vm88_vm4, 1, %v731_v21  ;;  %v120_v27 = vsel %vm113_vm5, 1, %v731_v21  ;;  %vm138_vm1 = vcmp.eq.s32.totalorder %v760_v1, %v779_v16 }
  0x6b   :  { %v406_v37 = vadd.s32 %v399_v7, %v381_v17  ;;  %vm316_vm6 = vcmp.eq.s32.totalorder %v838_v43, %v833_v39  ;;  %v102_v13 = vadd.s32 %v95_v26, %v77_v24  ;;  %vm163_vm7 = vcmp.eq.s32.totalorder %v760_v1, %v782_v18 }
  0x6c   :  { %v253_v28 = vadd.s32 %v246_v12, %v228_v23  ;;  %v298_v29 = vsel %vm291_vm2, 1, %v731_v21  ;;  %v145_v15 = vsel %vm138_vm1, 1, %v731_v21  ;;  %vm341_vm8 = vcmp.eq.s32.totalorder %v838_v43, %v840_v44 }
  0x6d   :  { %v431_v14 = vadd.s32 %v424_v9, %v406_v37  ;;  %v127_v34 = vadd.s32 %v120_v27, %v102_v13  ;;  %vm188_vm9 = vcmp.eq.s32.totalorder %v760_v1, %v784_v19  ;;  %v323_v38 = vsel %vm316_vm6, 1, %v731_v21  ;;  %v466_v9 = vld [vmem:[#allocation5 + $0x8] sm:$0xff] }
  0x6e   :  { %v280_v32 = vadd.s32 %v273_v22, %v253_v28  ;;  %v170_v40 = vsel %vm163_vm7, 1, %v731_v21  ;;  %vm366_vm10 = vcmp.eq.s32.totalorder %v838_v43, %v842_v45  ;;  %vm213_vm11 = vcmp.eq.s32.totalorder %v760_v1, %v786_v20 }
  0x6f   :  { %v456_v16 = vadd.s32 %v449_v10, %v431_v14  ;;  %v152_v18 = vadd.s32 %v145_v15, %v127_v34  ;;  %v348_v48 = vsel %vm341_vm8, 1, %v731_v21  ;;  %v195_v49 = vsel %vm188_vm9, 1, %v731_v21  ;;  %v468_v10 = vld [vmem:[#allocation5 + $0x18] sm:$0xff] }
  0x70   :  { %v305_v41 = vadd.s32 %v298_v29, %v280_v32  ;;  %vm391_vm12 = vcmp.eq.s32.totalorder %v838_v43, %v844_v46  ;;  %vm238_vm13 = vcmp.eq.s32.totalorder %v760_v1, %v800_v25  ;;  %v373_v50 = vsel %vm366_vm10, 1, %v731_v21 }
  0x71   :  { %v471_v42 = vcvt.s32.f32 %v456_v16  ;;  %v177_v19 = vadd.s32 %v170_v40, %v152_v18  ;;  %vm416_vm14 = vcmp.eq.s32.totalorder %v838_v43, %v846_v47  ;;  %v220_v20 = vsel %vm213_vm11, 1, %v731_v21 }
  0x72   :  { %v330_v36 = vadd.s32 %v323_v38, %v305_v41  ;;  %vm265_vm15 = vcmp.eq.s32.totalorder %v760_v1, %v807_v30  ;;  %v398_v54 = vsel %vm391_vm12, 1, %v731_v21  ;;  %v245_v25 = vsel %vm238_vm13, 1, %v731_v21 }
  0x73   :  { %628 = vmatprep.subr.mxu0 %v471_v42  ;;  %644 = vmatprep.subr.mxu1 %v471_v42  ;;  %v202_v52 = vadd.s32 %v195_v49, %v177_v19  ;;  %vm441_vm2 = vcmp.eq.s32.totalorder %v838_v43, %v859_v53  ;;  %vm290_vm3 = vcmp.eq.s32.totalorder %v760_v1, %v809_v31  ;;  %v423_v56 = vsel %vm416_vm14, 1, %v731_v21 }
  0x74   :  { %629 = vmatpush3.msra.mxu0 %v471_v42  ;;  %651 = vmatpush3.msra.mxu1 %v471_v42  ;;  %v355_v51 = vadd.s32 %v348_v48, %v330_v36  ;;  %v272_v57 = vsel %vm265_vm15, 1, %v731_v21  ;;  %vm315_vm4 = vcmp.eq.s32.totalorder %v760_v1, %v833_v39  ;;  %v448_v30 = vsel %vm441_vm2, 1, %v731_v21 }
  0x75   :  { %v227_v55 = vadd.s32 %v220_v20, %v202_v52  ;;  %v297_v60 = vsel %vm290_vm3, 1, %v731_v21  ;;  %vm340_vm5 = vcmp.eq.s32.totalorder %v760_v1, %v840_v44  ;;  %v322_v31 = vsel %vm315_vm4, 1, %v731_v21 }
  0x76   :  { %v380_v35 = vadd.s32 %v373_v50, %v355_v51  ;;  %vm365_vm1 = vcmp.eq.s32.totalorder %v760_v1, %v842_v45  ;;  %v347_v63 = vsel %vm340_vm5, 1, %v731_v21  ;;  %vm390_vm6 = vcmp.eq.s32.totalorder %v760_v1, %v844_v46 }
  0x77   :  { %v252_v59 = vadd.s32 %v245_v25, %v227_v55  ;;  %v372_v2 = vsel %vm365_vm1, 1, %v731_v21  ;;  %vm415_vm7 = vcmp.eq.s32.totalorder %v760_v1, %v846_v47  ;;  %v397_v44 = vsel %vm390_vm6, 1, %v731_v21 }
  0x78   :  { %v405_v58 = vadd.s32 %v398_v54, %v380_v35  ;;  %vm440_vm8 = vcmp.eq.s32.totalorder %v760_v1, %v859_v53  ;;  %v422_v4 = vsel %vm415_vm7, 1, %v731_v21 }
  0x79   :  { %v279_v62 = vadd.s32 %v272_v57, %v252_v59  ;;  %v447_v46 = vsel %vm440_vm8, 1, %v731_v21 }
  0x7a   :  { %v430_v61 = vadd.s32 %v423_v56, %v405_v58 }
  0x7b   :  { %v304_v33 = vadd.s32 %v297_v60, %v279_v62 }
  0x7c   :  { %v455_v43 = vadd.s32 %v448_v30, %v430_v61 }
  0x7d   :  { %v329_v39 = vadd.s32 %v322_v31, %v304_v33 }
  0x7e   :  { %v470_v0 = vcvt.s32.f32 %v455_v43 }
  0x7f   :  { %v354_v3 = vadd.s32 %v347_v63, %v329_v39 }
  0x80   :  { %630 = vmatprep.subr.mxu0 %v470_v0  ;;  %645 = vmatprep.subr.mxu1 %v470_v0 }
  0x81   :  { %631 = vmatpush3.msra.mxu0 %v470_v0  ;;  %652 = vmatpush3.msra.mxu1 %v470_v0  ;;  %v379_v45 = vadd.s32 %v372_v2, %v354_v3 }
  0x83   :  { %v404_v5 = vadd.s32 %v397_v44, %v379_v45 }
  0x85   :  { %v429_v6 = vadd.s32 %v422_v4, %v404_v5 }
  0x87   :  { %v454_v7 = vadd.s32 %v447_v46, %v429_v6 }
  0x89   :  { %v469_v8 = vcvt.s32.f32 %v454_v7 }
  0x8b   :  { %632 = vmatprep.subr.mxu0 %v469_v8  ;;  %646 = vmatprep.subr.mxu1 %v469_v8 }
  0x8c   :  { %633 = vmatpush3.msra.mxu0 %v469_v8  ;;  %653 = vmatpush3.msra.mxu1 %v469_v8 }
  0x8d   :  { %635 = vmatmul.mubr.msk.f32.vlgmr.msra.gmra.mxu0 %vm476_vm0, %v466_v9  ;;  %638 = vmatmul.mubr.msk.f32.vlgmr.msra.gmra.mxu1 %vm476_vm0, %v468_v10 }
 0x14d   :  { %v636_v47 = vpop.f32.mrf.mxu0  ;;  %v639_v1 = vpop.f32.mrf.mxu1 }
 0x14e   :  { %583 = vst [vmem:[#allocation7 + $0x8] sm:$0xff] %v636_v47  ;;  %585 = vst [vmem:[#allocation7 + $0x18] sm:$0xff] %v639_v1 }
 0x14f   :  { %v559_v53 = vpop.f32.mrf.mxu0  ;;  %v569_v11 = vpop.f32.mrf.mxu1 }
 0x150   :  { %582 = vst [vmem:[#allocation7] sm:$0xff] %v559_v53  ;;  %584 = vst [vmem:[#allocation7 + $0x10] sm:$0xff] %v569_v11 }
 0x151   :  { %712 = shalt.err (!%p709_p0)
}
 0x152   :  { %597 = dma.vmem_to_hbm [thread:$0]  %s592_s1, 512, %s1217_s2, [#allocation4], %s728_s12, %s728_s12, %s729_s13  }
 0x153   :  { %725 = dma.done.wait [#allocation4], 512  }
 0x154   :  { %726 = vsyncadd [#allocation4], 4294966784 }
 0x155   :  { %601 = vsyncpa [#allocation3], 1 }
 0x156   :  { %602 = vsyncpa [#allocation6], 1 }
 0x157   :  { %603 = vsyncpa [#allocation4], 1 }

</bundles_post_ra>
